<compile_context>
chip_gen: v6e
topology: v6e:2x2x1
jax: 0.10.0
libtpu: 0.0.40
codegen_flags: <defaults>
</compile_context>

<pallas_src>
import functools

import jax
import jax.numpy as jnp
from jax.experimental import pallas as pl
from jax.experimental.pallas import tpu as pltpu


# ------------------------------------------------------------------
# Fused Pallas kernel: RandomProjectionQuantizer + encoder stand-in
# ------------------------------------------------------------------
def _fused_kernel(x_ref, xm_ref, wt_ref, cbsum_ref, cbsq_ref, ew_ref, eb_ref,
                  enc_ref, label_ref, sum_t_ref, sum_t2_ref,
                  *, num_codes, seq_len):
    """One (batch b, time-tile ti) grid step.

    x_ref:     (1, tt, D)        bf16  UNMASKED rows (quantizer input)
    xm_ref:    (1, tt/pack, pack*D) bf16  masked rows, pack-per-lane-row
    wt_ref:    (D, Q)            bf16  random projection weight (transposed)
    cbsum_ref: (1, Q)            f32   sum_c code_book[q, c]
    cbsq_ref:  (1, Q)            f32   sum_c code_book[q, c]^2
    ew_ref:    (pack*D, pack*H)  bf16  block-diagonal encoder weight
    eb_ref:    (1, pack*H)       f32   tiled encoder bias
    enc_ref:   (1, tt/pack, pack*H)  f32  encoder output tile (lane-dense)
    label_ref: (1, 8, 128)       i32   argmin index, broadcast (lane-dense)
    sum_t_ref / sum_t2_ref: (1, Q) f32 VMEM accumulators (persist over ti)
    """
    ti = pl.program_id(1)
    nt = pl.num_programs(1)

    # ---- quantizer projection of the unmasked tile (bf16 MXU, f32 acc) ----
    t = jnp.dot(x_ref[0], wt_ref[...],
                preferred_element_type=jnp.float32)              # (tt, Q) f32

    @pl.when(ti == 0)
    def _():
        sum_t_ref[...] = jnp.zeros_like(sum_t_ref)
        sum_t2_ref[...] = jnp.zeros_like(sum_t2_ref)

    sum_t_ref[...] += jnp.sum(t, axis=0, keepdims=True)          # (1, Q)
    sum_t2_ref[...] += jnp.sum(t * t, axis=0, keepdims=True)     # (1, Q)

    # ---- encoder tile: block-diag weight -> full 128-lane output stores ----
    y = jnp.dot(xm_ref[0], ew_ref[...],
                preferred_element_type=jnp.float32)              # (ttp, pack*H)
    enc_ref[0] = (y + eb_ref[...]).astype(enc_ref.dtype)

    # ---- finalize labels after the last time tile of this batch ----
    @pl.when(ti == nt - 1)
    def _():
        q = cbsum_ref.shape[-1]
        # sum_{l,c} (t[l,q] - cb[q,c])^2
        #   = C * Σ_l t²  −  2 (Σ_l t)(Σ_c cb)  +  L * Σ_c cb²
        # sqrt dropped (monotone, argmin unchanged); f32 is ample here since
        # candidate gaps are O(10%) of the magnitudes at these scales.
        dist_sq = (float(num_codes) * sum_t2_ref[...]
                   - 2.0 * sum_t_ref[...] * cbsum_ref[...]
                   + float(seq_len) * cbsq_ref[...])             # (1, Q)
        min_val = jnp.min(dist_sq, axis=-1, keepdims=True)
        lane_ids = jax.lax.broadcasted_iota(jnp.int32, dist_sq.shape, 1)
        idx = jnp.min(jnp.where(dist_sq == min_val, lane_ids, q),
                      axis=-1, keepdims=True)                    # first min
        label_ref[0] = jnp.broadcast_to(idx, label_ref.shape[1:]).astype(
            jnp.int32)


def _pick_time_tile(T, pack, target_rows=512):
    """Largest time tile <= target that divides T; if smaller than T it also
    keeps the (8,128) sublane rule for both raw and packed row blocks."""
    step = 8 * pack
    if T <= target_rows or T % step != 0:
        return T
    tt = (target_rows // step) * step
    while tt > step and T % tt != 0:
        tt -= step
    return tt if T % tt == 0 else T


def bestrq_fused(x_bf16, xm_packed, proj_wt, cb_sum, cb_sumsq,
                 enc_w_packed, enc_b_packed, *, num_codes, tile_t):
    """Single pallas_call for quantizer labels + encoder output.

    x_bf16:       (B, T, D)            unmasked (quantizer input)
    xm_packed:    (B, T/pack, pack*D)  masked rows packed on the lane axis
    returns (enc_out_packed (B, T/pack, pack*H) f32, labels (B,) i32)
    """
    B, T, D = x_bf16.shape
    Q = proj_wt.shape[1]
    Tp, packD = xm_packed.shape[1], xm_packed.shape[2]
    packH = enc_w_packed.shape[1]
    pack = T // Tp

    tt = tile_t
    n_t = T // tt
    ttp = tt // pack

    enc_out, labels = pl.pallas_call(
        functools.partial(_fused_kernel, num_codes=num_codes, seq_len=T),
        out_shape=(jax.ShapeDtypeStruct((B, Tp, packH), jnp.float32),
                   jax.ShapeDtypeStruct((B, 8, 128), jnp.int32)),
        grid=(B, n_t),
        in_specs=[
            pl.BlockSpec((1, tt, D), lambda b, t: (b, t, 0)),       # unmasked
            pl.BlockSpec((1, ttp, packD), lambda b, t: (b, t, 0)),  # masked
            pl.BlockSpec((D, Q), lambda b, t: (0, 0)),              # resident
            pl.BlockSpec((1, Q), lambda b, t: (0, 0)),              # resident
            pl.BlockSpec((1, Q), lambda b, t: (0, 0)),              # resident
            pl.BlockSpec((packD, packH), lambda b, t: (0, 0)),      # resident
            pl.BlockSpec((1, packH), lambda b, t: (0, 0)),          # resident
        ],
        out_specs=(
            pl.BlockSpec((1, ttp, packH), lambda b, t: (b, t, 0)),
            pl.BlockSpec((1, 8, 128), lambda b, t: (b, 0, 0)),      # resident
        ),
        scratch_shapes=[pltpu.VMEM((1, Q), jnp.float32),
                        pltpu.VMEM((1, Q), jnp.float32)],
        compiler_params=pltpu.CompilerParams(
            dimension_semantics=("parallel", "arbitrary")),
    )(x_bf16, xm_packed, proj_wt, cb_sum, cb_sumsq, enc_w_packed, enc_b_packed)
    return enc_out, labels[:, 0, 0]          # tiny XLA slice, fused under jit


# ------------------------------------------------------------------
# BestRqFramework (raw_signal=True)
# ------------------------------------------------------------------
class BestRqFrameworkPallas:
    def __init__(self, input_feature_size, encoder_hidden_size, num_code_books,
                 mask_time, mask_prob=0.1, num_masks_per_signal=5,
                 encoder_out_size=32, seed=0):
        self.D = input_feature_size                 # == input_quantizer_dim
        self.Q = encoder_hidden_size
        self.C = num_code_books
        self.H = encoder_out_size
        self.mask_time = mask_time
        self.mask_prob = mask_prob
        self.num_masks_per_signal = num_masks_per_signal

        kp, kc, kw, kb = jax.random.split(jax.random.PRNGKey(seed), 4)

        # RandomProjectionQuantizer params (frozen, deterministic init)
        bound = (6.0 / (self.D + self.Q)) ** 0.5    # xavier_uniform
        self.proj_w = jax.random.uniform(kp, (self.Q, self.D), jnp.float32,
                                         -bound, bound)
        self.proj_wt_bf16 = self.proj_w.T.astype(jnp.bfloat16)     # (D, Q)
        self.code_book = jax.random.normal(kc, (self.Q, self.C), jnp.float32)
        # Codebook is frozen -> its distance statistics are constants; hoist
        # them out of the kernel (drops the (C,Q) DMA and O(T*C*Q) VPU work).
        self.cb_sum = jnp.sum(self.code_book, axis=1).reshape(1, self.Q)
        self.cb_sumsq = jnp.sum(self.code_book ** 2, axis=1).reshape(1, self.Q)

        # Stand-in encoder: Linear(600 -> encoder_out_size)
        # TODO(synk): the real ctor takes an arbitrary nn.Module encoder.
        self.enc_w = 0.02 * jax.random.normal(kw, (600, encoder_out_size),
                                              jnp.float32)
        self.enc_b = 0.02 * jax.random.normal(kb, (1, encoder_out_size),
                                              jnp.float32)

        # Rows packed per 128-lane output row (lane-dense encoder stores).
        self._pack_lane = 128 // self.H if 128 % self.H == 0 else 1

        # Whole forward (masking glue + fused Pallas kernel) under one jit.
        self._forward_jit = jax.jit(self._forward_impl, static_argnums=(2,))

    # -------- masking (stochastic; fully traceable JAX glue) --------
    def masking(self, input_tensor, key, min_mask=0):
        # TODO(synk): torch version uses torch/python RNG and a boolean-mask
        # gather of data-dependent size; reproduced structurally with
        # jax.random (different random stream, same semantics) and kept
        # fully traceable (no int()/Python-if on device values).
        B, T, D = input_tensor.shape
        k_logits, k_idx, k_noise = jax.random.split(key, 3)

        seq_mask = jnp.ones((B, T), dtype=bool)
        num_to_mask = jnp.maximum(
            seq_mask.sum(axis=-1, keepdims=True) * self.mask_prob, min_mask)
        logits = jax.random.uniform(k_logits, (B, T))
        logits = jnp.where(seq_mask, logits, -1.0)
        randperm = jnp.argsort(logits, axis=-1).astype(jnp.float32)
        num_padding = (~seq_mask).sum(axis=-1, keepdims=True)
        randperm = randperm - num_padding
        subset_mask = (randperm < num_to_mask) & seq_mask

        masked = input_tensor
        idx_keys = jax.random.split(k_idx, self.num_masks_per_signal)
        noise_keys = jax.random.split(k_noise, self.num_masks_per_signal)
        max_start = max(D - self.mask_time, 0)
        for i in range(self.num_masks_per_signal):
            # python random.randint(0, D) is inclusive -> maxval = D + 1
            idx = jax.random.randint(idx_keys[i], (), 0, D + 1)       # traced
            in_range = (idx + self.mask_time) <= D                    # traced
            start = jnp.clip(idx, 0, max_start)
            noise = 0.1 * jax.random.normal(noise_keys[i],
                                            (B, T, self.mask_time))
            seg = jax.lax.dynamic_slice_in_dim(masked, start,
                                               self.mask_time, axis=2)
            new_seg = jnp.where(subset_mask[:, :, None] & in_range, noise, seg)
            masked = jax.lax.dynamic_update_slice_in_dim(masked, new_seg,
                                                         start, axis=2)
        return masked, subset_mask

    # -------- forward --------
    def _forward_impl(self, input_values, key, masking=True):
        B, T, D = input_values.shape
        if masking:
            masked, _ = self.masking(input_values, key)
            masked = masked.reshape(1, -1, 600)      # torch: .view(1, -1, 600)
        else:
            masked = input_values                    # torch: clone()
        lead_shape = masked.shape[:-1]

        enc_rows = masked.reshape(-1, masked.shape[-1])
        # Fused kernel couples quantizer and encoder row tiling; requires the
        # encoder row layout to be the (B*T, D) flattening of the input.
        assert enc_rows.shape == (B * T, D)

        pack = self._pack_lane if (self._pack_lane > 1
                                   and T % self._pack_lane == 0) else 1
        if pack > 1:
            # Block-diagonal weight -> the (tt, H) result comes out already
            # packed as (tt/pack, 128): unmasked full-lane output stores.
            enc_w_use = jnp.kron(jnp.eye(pack, dtype=jnp.float32),
                                 self.enc_w).astype(jnp.bfloat16)
            enc_b_use = jnp.tile(self.enc_b, (1, pack))
        else:
            enc_w_use = self.enc_w.astype(jnp.bfloat16)
            enc_b_use = self.enc_b
        xm_packed = enc_rows.reshape(B, T // pack, pack * D).astype(jnp.bfloat16)

        tile_t = _pick_time_tile(T, pack)
        enc_out_packed, labels = bestrq_fused(
            input_values.astype(jnp.bfloat16), xm_packed,
            self.proj_wt_bf16, self.cb_sum, self.cb_sumsq,
            enc_w_use, enc_b_use, num_codes=self.C, tile_t=tile_t)

        # (B, T/pack, pack*H) row-major == (B*T, H) row-major: free reshape.
        encoder_out = enc_out_packed.reshape(*lead_shape, self.H)
        return encoder_out, labels

    def forward(self, input_values, key, masking=True):
        return self._forward_jit(input_values, key, masking)


# ------------------------------------------------------------------
if __name__ == "__main__":
    key = jax.random.PRNGKey(0)
    k_in, k_mask = jax.random.split(key)

    # small shapes: B=2, T=4, D=600 (D=600 so .view(1, -1, 600) is valid)
    B, T, D = 2, 4, 600
    x = jax.random.normal(k_in, (B, T, D), jnp.float32)

    model = BestRqFrameworkPallas(
        input_feature_size=D,
        encoder_hidden_size=32,    # quantizer_dim Q
        num_code_books=16,         # codebook_size C
        mask_time=10,
        mask_prob=0.1,
        num_masks_per_signal=5,
        encoder_out_size=32,
        seed=0,
    )

    # Masked path (the torch default): encoder sees masked rows, labels come
    # from the original signal.
    encoder_out, labels = model.forward(x, k_mask, masking=True)
    jax.block_until_ready((encoder_out, labels))
    assert encoder_out.shape == (1, B * T, 32)
    assert labels.shape == (B,)

    # Unmasked path: directly validates the encoder matmul + lane-dense
    # packing (encoder input == x) and that labels are masking-independent.
    enc_nomask, labels_nomask = model.forward(x, k_mask, masking=False)
    jax.block_until_ready((enc_nomask, labels_nomask))
    assert enc_nomask.shape == (B, T, 32)

    x16 = x.astype(jnp.bfloat16)
    ref_enc = jnp.einsum("btd,dh->bth", x16, model.enc_w.astype(jnp.bfloat16),
                         preferred_element_type=jnp.float32) + model.enc_b[0]
    assert bool(jnp.allclose(enc_nomask, ref_enc, rtol=1e-2, atol=1e-2))
    assert bool(jnp.array_equal(labels, labels_nomask))

    # Labels: tolerance-aware check against the torch-style distance formula,
    # using the same bf16 projection operands as the kernel (the kernel uses
    # the closed-form expansion, so check the picked index attains the min).
    targets = jnp.einsum("btd,qd->btq", x16, model.proj_w.astype(jnp.bfloat16),
                         preferred_element_type=jnp.float32)      # (B, T, Q)
    diff = targets[..., None] - model.code_book[None, None]       # (B,T,Q,C)
    ref_dist = jnp.sqrt(jnp.sum(diff * diff, axis=(1, 3)))        # (B, Q)
    ref_min = jnp.min(ref_dist, axis=-1)
    picked = ref_dist[jnp.arange(B), labels]
    assert bool(jnp.all(picked <= ref_min * 1.01 + 1e-3))

    print("KERNEL_OK")
</pallas_src>

<mosaic_0001>
module attributes {stable_mosaic.version = 11 : i64} {
  func.func @_fused_kernel(%arg0: i32, %arg1: i32, %arg2: memref<1x4x600xbf16, #tpu.memory_space<vmem>>, %arg3: memref<1x1x2400xbf16, #tpu.memory_space<vmem>>, %arg4: memref<600x32xbf16, #tpu.memory_space<vmem>>, %arg5: memref<1x32xf32, #tpu.memory_space<vmem>>, %arg6: memref<1x32xf32, #tpu.memory_space<vmem>>, %arg7: memref<2400x128xbf16, #tpu.memory_space<vmem>>, %arg8: memref<1x128xf32, #tpu.memory_space<vmem>>, %arg9: memref<1x1x128xf32, #tpu.memory_space<vmem>>, %arg10: memref<1x8x128xi32, #tpu.memory_space<vmem>>, %arg11: memref<1x32xf32, #tpu.memory_space<vmem>>, %arg12: memref<1x32xf32, #tpu.memory_space<vmem>>) attributes {dimension_semantics = [#tpu.dimension_semantics<parallel>, #tpu.dimension_semantics<arbitrary>], iteration_bounds = array<i64: 2, 1>, scalar_prefetch = 0 : i64, scratch_operands = 2 : i64, tpu.core_type = #tpu.core_type<tc>, window_params = [{transform_indices = @transform_0, window_bounds = array<i64: 1, 4, 600>}, {transform_indices = @transform_1, window_bounds = array<i64: 1, 1, 2400>}, {pipeline_mode = #tpu.pipeline_mode<synchronous>, transform_indices = @transform_2, window_bounds = array<i64: 600, 32>}, {pipeline_mode = #tpu.pipeline_mode<synchronous>, transform_indices = @transform_3, window_bounds = array<i64: 1, 32>}, {pipeline_mode = #tpu.pipeline_mode<synchronous>, transform_indices = @transform_4, window_bounds = array<i64: 1, 32>}, {pipeline_mode = #tpu.pipeline_mode<synchronous>, transform_indices = @transform_5, window_bounds = array<i64: 2400, 128>}, {pipeline_mode = #tpu.pipeline_mode<synchronous>, transform_indices = @transform_6, window_bounds = array<i64: 1, 128>}, {transform_indices = @transform_7, window_bounds = array<i64: 1, 1, 128>}, {transform_indices = @transform_8, window_bounds = array<i64: 1, 8, 128>}]} {
    %c0 = arith.constant 0 : index
    %c0_0 = arith.constant 0 : index
    %c0_1 = arith.constant 0 : index
    %0 = vector.load %arg2[%c0, %c0_0, %c0_1] : memref<1x4x600xbf16, #tpu.memory_space<vmem>>, vector<1x4x600xbf16>
    %1 = vector.shape_cast %0 : vector<1x4x600xbf16> to vector<4x600xbf16>
    %c0_2 = arith.constant 0 : index
    %c0_3 = arith.constant 0 : index
    %2 = vector.load %arg4[%c0_2, %c0_3] : memref<600x32xbf16, #tpu.memory_space<vmem>>, vector<600x32xbf16>
    %cst = arith.constant dense<0.000000e+00> : vector<4x32xf32>
    %3 = tpu.matmul %1, %2, %cst {dimension_numbers = #tpu.dot_dimension_numbers<[1], [0], [0], [1], [0, 0, 1, 1], [], []>} : vector<4x600xbf16>, vector<600x32xbf16>, vector<4x32xf32> -> vector<4x32xf32>
    %c0_i32 = arith.constant 0 : i32
    %4 = arith.cmpi eq, %arg1, %c0_i32 : i32
    %5 = arith.extui %4 : i1 to i32
    %c0_i32_4 = arith.constant 0 : i32
    %6 = arith.cmpi ne, %5, %c0_i32_4 : i32
    scf.if %6 {
      %cst_28 = arith.constant 0.000000e+00 : f32
      %30 = vector.broadcast %cst_28 : f32 to vector<1x32xf32>
      %c0_29 = arith.constant 0 : index
      %c0_30 = arith.constant 0 : index
      %31 = vector.load %arg11[%c0_29, %c0_30] : memref<1x32xf32, #tpu.memory_space<vmem>>, vector<1x32xf32>
      tpu.vector_store %arg11[%c0_29, %c0_30], %30 {strides = array<i32>} : memref<1x32xf32, #tpu.memory_space<vmem>>, vector<1x32xf32>,
      %cst_31 = arith.constant 0.000000e+00 : f32
      %32 = vector.broadcast %cst_31 : f32 to vector<1x32xf32>
      %c0_32 = arith.constant 0 : index
      %c0_33 = arith.constant 0 : index
      %33 = vector.load %arg12[%c0_32, %c0_33] : memref<1x32xf32, #tpu.memory_space<vmem>>, vector<1x32xf32>
      tpu.vector_store %arg12[%c0_32, %c0_33], %32 {strides = array<i32>} : memref<1x32xf32, #tpu.memory_space<vmem>>, vector<1x32xf32>,
    } else {
    }
    %c0_5 = arith.constant 0 : index
    %c0_6 = arith.constant 0 : index
    %7 = vector.load %arg11[%c0_5, %c0_6] : memref<1x32xf32, #tpu.memory_space<vmem>>, vector<1x32xf32>
    %cst_7 = arith.constant dense<0.000000e+00> : vector<32xf32>
    %8 = vector.multi_reduction <add>, %3, %cst_7 [0] : vector<4x32xf32> to vector<32xf32>
    %9 = vector.shape_cast %8 : vector<32xf32> to vector<1x32xf32>
    %10 = arith.addf %7, %9 : vector<1x32xf32>
    %c0_8 = arith.constant 0 : index
    %c0_9 = arith.constant 0 : index
    %11 = vector.load %arg11[%c0_8, %c0_9] : memref<1x32xf32, #tpu.memory_space<vmem>>, vector<1x32xf32>
    tpu.vector_store %arg11[%c0_8, %c0_9], %10 {strides = array<i32>} : memref<1x32xf32, #tpu.memory_space<vmem>>, vector<1x32xf32>,
    %c0_10 = arith.constant 0 : index
    %c0_11 = arith.constant 0 : index
    %12 = vector.load %arg12[%c0_10, %c0_11] : memref<1x32xf32, #tpu.memory_space<vmem>>, vector<1x32xf32>
    %13 = arith.mulf %3, %3 : vector<4x32xf32>
    %cst_12 = arith.constant dense<0.000000e+00> : vector<32xf32>
    %14 = vector.multi_reduction <add>, %13, %cst_12 [0] : vector<4x32xf32> to vector<32xf32>
    %15 = vector.shape_cast %14 : vector<32xf32> to vector<1x32xf32>
    %16 = arith.addf %12, %15 : vector<1x32xf32>
    %c0_13 = arith.constant 0 : index
    %c0_14 = arith.constant 0 : index
    %17 = vector.load %arg12[%c0_13, %c0_14] : memref<1x32xf32, #tpu.memory_space<vmem>>, vector<1x32xf32>
    tpu.vector_store %arg12[%c0_13, %c0_14], %16 {strides = array<i32>} : memref<1x32xf32, #tpu.memory_space<vmem>>, vector<1x32xf32>,
    %c0_15 = arith.constant 0 : index
    %c0_16 = arith.constant 0 : index
    %c0_17 = arith.constant 0 : index
    %18 = vector.load %arg3[%c0_15, %c0_16, %c0_17] : memref<1x1x2400xbf16, #tpu.memory_space<vmem>>, vector<1x1x2400xbf16>
    %19 = vector.shape_cast %18 : vector<1x1x2400xbf16> to vector<1x2400xbf16>
    %c0_18 = arith.constant 0 : index
    %c0_19 = arith.constant 0 : index
    %20 = vector.load %arg7[%c0_18, %c0_19] : memref<2400x128xbf16, #tpu.memory_space<vmem>>, vector<2400x128xbf16>
    %cst_20 = arith.constant dense<0.000000e+00> : vector<1x128xf32>
    %21 = tpu.matmul %19, %20, %cst_20 {dimension_numbers = #tpu.dot_dimension_numbers<[1], [0], [0], [1], [0, 0, 1, 1], [], []>} : vector<1x2400xbf16>, vector<2400x128xbf16>, vector<1x128xf32> -> vector<1x128xf32>
    %c0_21 = arith.constant 0 : index
    %c0_22 = arith.constant 0 : index
    %22 = vector.load %arg8[%c0_21, %c0_22] : memref<1x128xf32, #tpu.memory_space<vmem>>, vector<1x128xf32>
    %23 = arith.addf %21, %22 : vector<1x128xf32>
    %c0_23 = arith.constant 0 : index
    %c0_24 = arith.constant 0 : index
    %c0_25 = arith.constant 0 : index
    %24 = vector.load %arg9[%c0_23, %c0_24, %c0_25] : memref<1x1x128xf32, #tpu.memory_space<vmem>>, vector<1x1x128xf32>
    %25 = vector.shape_cast %24 : vector<1x1x128xf32> to vector<1x128xf32>
    %26 = vector.shape_cast %23 : vector<1x128xf32> to vector<1x1x128xf32>
    tpu.vector_store %arg9[%c0_23, %c0_24, %c0_25], %26 {strides = array<i32>} : memref<1x1x128xf32, #tpu.memory_space<vmem>>, vector<1x1x128xf32>,
    %c0_i32_26 = arith.constant 0 : i32
    %27 = arith.cmpi eq, %arg1, %c0_i32_26 : i32
    %28 = arith.extui %27 : i1 to i32
    %c0_i32_27 = arith.constant 0 : i32
    %29 = arith.cmpi ne, %28, %c0_i32_27 : i32
    scf.if %29 {
      %c0_28 = arith.constant 0 : index
      %c0_29 = arith.constant 0 : index
      %30 = vector.load %arg12[%c0_28, %c0_29] : memref<1x32xf32, #tpu.memory_space<vmem>>, vector<1x32xf32>
      %cst_30 = arith.constant 1.600000e+01 : f32
      %31 = vector.broadcast %cst_30 : f32 to vector<1x32xf32>
      %32 = arith.mulf %31, %30 : vector<1x32xf32>
      %c0_31 = arith.constant 0 : index
      %c0_32 = arith.constant 0 : index
      %33 = vector.load %arg11[%c0_31, %c0_32] : memref<1x32xf32, #tpu.memory_space<vmem>>, vector<1x32xf32>
      %cst_33 = arith.constant 2.000000e+00 : f32
      %34 = vector.broadcast %cst_33 : f32 to vector<1x32xf32>
      %35 = arith.mulf %34, %33 : vector<1x32xf32>
      %c0_34 = arith.constant 0 : index
      %c0_35 = arith.constant 0 : index
      %36 = vector.load %arg5[%c0_34, %c0_35] : memref<1x32xf32, #tpu.memory_space<vmem>>, vector<1x32xf32>
      %37 = arith.mulf %35, %36 : vector<1x32xf32>
      %38 = arith.subf %32, %37 : vector<1x32xf32>
      %c0_36 = arith.constant 0 : index
      %c0_37 = arith.constant 0 : index
      %39 = vector.load %arg6[%c0_36, %c0_37] : memref<1x32xf32, #tpu.memory_space<vmem>>, vector<1x32xf32>
      %cst_38 = arith.constant 4.000000e+00 : f32
      %40 = vector.broadcast %cst_38 : f32 to vector<1x32xf32>
      %41 = arith.mulf %40, %39 : vector<1x32xf32>
      %42 = arith.addf %38, %41 : vector<1x32xf32>
      %cst_39 = arith.constant dense<0x7F800000> : vector<1xf32>
      %43 = vector.multi_reduction <minimumf>, %42, %cst_39 [1] : vector<1x32xf32> to vector<1xf32>
      %44 = vector.shape_cast %43 : vector<1xf32> to vector<1x1xf32>
      %45 = tpu.iota {dimensions = array<i32: 1>} : vector<1x32xi32>
      %46 = vector.broadcast %44 : vector<1x1xf32> to vector<1x32xf32>
      %47 = arith.cmpf oeq, %42, %46 : vector<1x32xf32>
      %c32_i32 = arith.constant 32 : i32
      %48 = vector.broadcast %c32_i32 : i32 to vector<1x32xi32>
      %49 = arith.select %47, %45, %48 : vector<1x32xi1>, vector<1x32xi32>
      %cst_40 = arith.constant dense<2147483647> : vector<1xi32>
      %50 = vector.multi_reduction <minsi>, %49, %cst_40 [1] : vector<1x32xi32> to vector<1xi32>
      %51 = vector.shape_cast %50 : vector<1xi32> to vector<1x1xi32>
      %52 = vector.shape_cast %51 : vector<1x1xi32> to vector<1x1xi32>
      %53 = vector.broadcast %52 : vector<1x1xi32> to vector<8x128xi32>
      %c0_41 = arith.constant 0 : index
      %c0_42 = arith.constant 0 : index
      %c0_43 = arith.constant 0 : index
      %54 = vector.load %arg10[%c0_41, %c0_42, %c0_43] : memref<1x8x128xi32, #tpu.memory_space<vmem>>, vector<1x8x128xi32>
      %55 = vector.shape_cast %54 : vector<1x8x128xi32> to vector<8x128xi32>
      %56 = vector.shape_cast %53 : vector<8x128xi32> to vector<1x8x128xi32>
      tpu.vector_store %arg10[%c0_41, %c0_42, %c0_43], %56 {strides = array<i32>} : memref<1x8x128xi32, #tpu.memory_space<vmem>>, vector<1x8x128xi32>,
    } else {
    }
    return
  }
  func.func @transform_0(%arg0: i32, %arg1: i32) -> (i32, i32, i32) {
    %c0_i32 = arith.constant 0 : i32
    %c0_i32_0 = arith.constant 0 : i32
    return %arg0, %arg1, %c0_i32 : i32, i32, i32
  }
  func.func @transform_1(%arg0: i32, %arg1: i32) -> (i32, i32, i32) {
    %c0_i32 = arith.constant 0 : i32
    %c0_i32_0 = arith.constant 0 : i32
    return %arg0, %arg1, %c0_i32 : i32, i32, i32
  }
  func.func @transform_2(%arg0: i32, %arg1: i32) -> (i32, i32) {
    %c0_i32 = arith.constant 0 : i32
    %c0_i32_0 = arith.constant 0 : i32
    %c0_i32_1 = arith.constant 0 : i32
    return %c0_i32, %c0_i32_0 : i32, i32
  }
  func.func @transform_3(%arg0: i32, %arg1: i32) -> (i32, i32) {
    %c0_i32 = arith.constant 0 : i32
    %c0_i32_0 = arith.constant 0 : i32
    %c0_i32_1 = arith.constant 0 : i32
    return %c0_i32, %c0_i32_0 : i32, i32
  }
  func.func @transform_4(%arg0: i32, %arg1: i32) -> (i32, i32) {
    %c0_i32 = arith.constant 0 : i32
    %c0_i32_0 = arith.constant 0 : i32
    %c0_i32_1 = arith.constant 0 : i32
    return %c0_i32, %c0_i32_0 : i32, i32
  }
  func.func @transform_5(%arg0: i32, %arg1: i32) -> (i32, i32) {
    %c0_i32 = arith.constant 0 : i32
    %c0_i32_0 = arith.constant 0 : i32
    %c0_i32_1 = arith.constant 0 : i32
    return %c0_i32, %c0_i32_0 : i32, i32
  }
  func.func @transform_6(%arg0: i32, %arg1: i32) -> (i32, i32) {
    %c0_i32 = arith.constant 0 : i32
    %c0_i32_0 = arith.constant 0 : i32
    %c0_i32_1 = arith.constant 0 : i32
    return %c0_i32, %c0_i32_0 : i32, i32
  }
  func.func @transform_7(%arg0: i32, %arg1: i32) -> (i32, i32, i32) {
    %c0_i32 = arith.constant 0 : i32
    %c0_i32_0 = arith.constant 0 : i32
    return %arg0, %arg1, %c0_i32 : i32, i32, i32
  }
  func.func @transform_8(%arg0: i32, %arg1: i32) -> (i32, i32, i32) {
    %c0_i32 = arith.constant 0 : i32
    %c0_i32_0 = arith.constant 0 : i32
    %c0_i32_1 = arith.constant 0 : i32
    return %arg0, %c0_i32, %c0_i32_0 : i32, i32, i32
  }
}

</mosaic_0001>

<bundles_post_ra>
// kernel: _forward_impl.1
= control target key start
LH: loop header
LB: loop body
LE: loop exit
PB: predicated region body
PF: predicated region fallthrough
CT: control target
= control target key end

     0   :  { %s3565_s27 = smov 0   ;;  %s3567_s28 = smov 0   ;;  %s4276_s0 = inlined_call_operand.vmem [shape: bf16[2,4,600], index: 0, kind: input, shape index: {}]   ;;  %s4277_s1 = inlined_call_operand.vmem [shape: bf16[2,1,2400], index: 1, kind: input, shape index: {}]   ;;  %s4278_s2 = inlined_call_operand.vmem [shape: bf16[600,32], index: 2, kind: input, shape index: {}]   ;;  %s4279_s3 = inlined_call_operand.vmem [shape: f32[1,32], index: 3, kind: input, shape index: {}]   ;;  %s4280_s4 = inlined_call_operand.vmem [shape: f32[1,32], index: 4, kind: input, shape index: {}]   ;;  %s4281_s5 = inlined_call_operand.vmem [shape: bf16[2400,128], index: 5, kind: input, shape index: {}]   ;;  %s4282_s6 = inlined_call_operand.vmem [shape: f32[1,128], index: 6, kind: input, shape index: {}]   ;;  %s4283_s7 = inlined_call_operand.vmem [shape: f32[2,1,128], index: 7, kind: output, shape index: {0}]   ;;  %s4284_s8 = inlined_call_operand.vmem [shape: s32[2,8,128], index: 8, kind: output, shape index: {1}]  }
   0x1   :  { %s3569_s29 = smov 0  }
   0x2 LB: > { %s31_s30 = sadd.s32 1, %s3510_s28  ;;  %p2787_p0 = scmp.ge.s32.totalorder %s3514_s29, 1  ;;  %s3514_s29 = sphi %s3569_s29, %s19_s29   ;;  %s3510_s28 = sphi %s3567_s28, %s4286_s28   ;;  %s3506_s27 = sphi %s3565_s27, %s4285_s27  }
   0x3   : > { %p33_p1 = scmp.ge.s32.totalorder %s31_s30, 2  ;;  %p300_p2 = scmp.lt.s32.totalorder %s3514_s29, 3 }
   0x5   : > { %s4288_s30 = smov (%p33_p1, %s31_s30), 0  ;;  %p301_p3 = pnand %p2787_p0, %p300_p2 }
   0x6   : > { %p351_p4 = scmp.lt.s32.totalorder (!%p301_p3), %s3506_s27, 1 }
   0x7   : > { %304 = sbr.rel (%p301_p3) target bundleno = 727 (0x2d7), region = 48 }
   0xc   : > { %v3302_v0 = vld [vmem:[%s4278_s2 + $0x78] sm:$0xff]   ;;  %v3306_v4 = vld [vmem:[%s4278_s2 + $0x70] sm:$0xff]   ;;  %v3310_v8 = vld [vmem:[%s4278_s2 + $0x68] sm:$0xff]   ;;  %s4290_s27 = smov (!%p351_p4, %s3506_s27), 1  ;;  %v462_v30 = vlaneseq  ;;  %v3516_v35 = vmov 0.0   ;;  %vm715_vm0 = vcmask 1043456  }
   0xd   : > { %v3303_v1 = vld [vmem:[%s4278_s2 + $0xf8] sm:$0xff]   ;;  %2984 = vmatprep.subr.bf16.mxu0 %v3302_v0  ;;  %v3307_v5 = vld [vmem:[%s4278_s2 + $0xf0] sm:$0xff]   ;;  %v3311_v9 = vld [vmem:[%s4278_s2 + $0xe8] sm:$0xff]   ;;  %s3272_s9 = smul.u32 10, %s4290_s27  ;;  %v3517_v36 = vmov 1983009808   ;;  %s373_s12 = scalar_lea.vmem %s4283_s7, %s4290_s27 }
   0xe   : > { %v3304_v2 = vld [vmem:[%s4278_s2 + $0x38] sm:$0xff]   ;;  %3006 = vmatprep.subr.bf16.mxu1 %v3303_v1  ;;  %v3308_v6 = vld [vmem:[%s4278_s2 + $0x30] sm:$0xff]   ;;  %v3312_v10 = vld [vmem:[%s4278_s2 + $0x28] sm:$0xff]   ;;  %v3693_v34 = vshrl.u32 %v462_v30, 7  ;;  %v460_v37 = vunpack.c.l.s4 %v3517_v36  ;;  %vm3518_vm1 = vmmov 0   ;;  %vm711_vm2 = vcmask 719872  }
   0xf   : > { %v3305_v3 = vld [vmem:[%s4278_s2 + $0xb8] sm:$0xff]   ;;  %2985 = vmatpush3.bf16.msra.mxu0 %v3304_v2  ;;  %v3309_v7 = vld [vmem:[%s4278_s2 + $0xb0] sm:$0xff]   ;;  %v3313_v11 = vld [vmem:[%s4278_s2 + $0xa8] sm:$0xff]   ;;  %s3686_s20 = scalar_lea.vmem %s4276_s0, %s3272_s9  ;;  %v3519_v63 = vmov 1966171168   ;;  %vm843_vm3 = vcmask 253952  }
  0x10   : > { %3007 = vmatpush3.bf16.msra.mxu1 %v3305_v3  ;;  %2986 = vmatprep.subr.bf16.mxu0 %v3306_v4  ;;  %v3314_v12 = vld [vmem:[%s4278_s2 + $0x60] sm:$0xff]   ;;  %v3318_v16 = vld [vmem:[%s4278_s2 + $0x58] sm:$0xff]   ;;  %v3322_v20 = vld [vmem:[%s4278_s2 + $0x50] sm:$0xff]   ;;  %v461_v39 = vunpack.c.0.s8 %v460_v37  ;;  %v1178_v0 = vunpack.c.l.s4 %v3519_v63  ;;  %844 = vst.msk [vmem:[#allocation2] sm:$0x1] %vm843_vm3, %v3516_v35  ;;  %s3273_s19 = smul.u32 19, %s4290_s27 }
  0x11   : > { %3008 = vmatprep.subr.bf16.mxu1 %v3307_v5  ;;  %v3315_v13 = vld [vmem:[%s4278_s2 + $0xe0] sm:$0xff]   ;;  %v3319_v17 = vld [vmem:[%s4278_s2 + $0xd8] sm:$0xff]   ;;  %v3323_v21 = vld [vmem:[%s4278_s2 + $0xd0] sm:$0xff]   ;;  %845 = vst.msk [vmem:[#allocation3] sm:$0x1] %vm843_vm3, %v3516_v35  ;;  %vm847_vm4 = vcmask 257024  }
  0x12   : > { %v3316_v14 = vld [vmem:[%s4278_s2 + $0x20] sm:$0xff]   ;;  %v3320_v18 = vld [vmem:[%s4278_s2 + $0x18] sm:$0xff]   ;;  %v3324_v22 = vld [vmem:[%s4278_s2 + $0x10] sm:$0xff]   ;;  %v464_v41 = vsub.s32 %v461_v39, %v3693_v34  ;;  %v1179_v5 = vunpack.c.0.s8 %v1178_v0  ;;  %s3797_s26 = scalar_lea.vmem %s4277_s1, %s3273_s19  ;;  %vm2215_vm5 = vcmask 785408  }
  0x13   : > { %2987 = vmatpush3.bf16.msra.mxu0 %v3308_v6  ;;  %v3317_v15 = vld [vmem:[%s4278_s2 + $0xa0] sm:$0xff]   ;;  %v3321_v19 = vld [vmem:[%s4278_s2 + $0x98] sm:$0xff]   ;;  %v3325_v23 = vld [vmem:[%s4278_s2 + $0x90] sm:$0xff]  }
  0x14   : > { %3009 = vmatpush3.bf16.msra.mxu1 %v3309_v7  ;;  %2988 = vmatprep.subr.bf16.mxu0 %v3310_v8  ;;  %v3326_v24 = vld [vmem:[%s4278_s2 + $0x48] sm:$0xff]   ;;  %v3330_v28 = vld [vmem:[%s4278_s2 + $0x40] sm:$0xff]   ;;  %v3337_v48 = vld [vmem:[%s4278_s2 + $0x118] sm:$0xff]  }
  0x15   : > { %3010 = vmatprep.subr.bf16.mxu1 %v3311_v9  ;;  %v3327_v25 = vld [vmem:[%s4278_s2 + $0xc8] sm:$0xff]   ;;  %v3331_v29 = vld [vmem:[%s4278_s2 + $0xc0] sm:$0xff]   ;;  %v3338_v49 = vld [vmem:[%s4278_s2 + $0x110] sm:$0xff]  }
  0x16   : > { %v3328_v26 = vld [vmem:[%s4278_s2 + $0x8] sm:$0xff]   ;;  %v3332_v31 = vld [vmem:[%s4278_s2] sm:$0xff]   ;;  %v3341_v53 = vld [vmem:[%s4281_s5 + $0x78] sm:$0xff]  }
  0x17   : > { %2989 = vmatpush3.bf16.msra.mxu0 %v3312_v10  ;;  %v3329_v27 = vld [vmem:[%s4278_s2 + $0x88] sm:$0xff]   ;;  %v3333_v32 = vld [vmem:[%s4278_s2 + $0x80] sm:$0xff]   ;;  %v3342_v54 = vld [vmem:[%s4281_s5 + $0x38] sm:$0xff]   ;;  %v3782_v10 = vsub.s32 %v1179_v5, %v3693_v34 }
  0x18   : > { %3011 = vmatpush3.bf16.msra.mxu1 %v3313_v11  ;;  %2990 = vmatprep.subr.bf16.mxu0 %v3314_v12  ;;  %v379_v33 = vld [vmem:[%s3686_s20] sm:$0xff]  ;;  %v3335_v38 = vld [vmem:[%s4278_s2 + $0x128] ss:$0 sps:$4 sm:$0xff]   ;;  %v3343_v55 = vld [vmem:[%s4281_s5 + $0x70] sm:$0xff]  }
  0x19   : > { %3012 = vmatprep.subr.bf16.mxu1 %v3315_v13  ;;  %v458_v40 = vcombine.high %v379_v33, %v379_v33  ;;  %v717_v42 = vsel %vm715_vm0, %v3335_v38, 0  ;;  %v465_v43 = vrot.slane %v379_v33, %v464_v41  ;;  %v3336_v47 = vld [vmem:[%s4278_s2 + $0x120] sm:$0xff]   ;;  %v3339_v50 = vld [vmem:[%s4278_s2 + $0x108] sm:$0xff]   ;;  %v3344_v56 = vld [vmem:[%s4281_s5 + $0x30] sm:$0xff]  }
  0x1a   : > { %v3340_v51 = vld [vmem:[%s4278_s2 + $0x100] sm:$0xff]   ;;  %v2790_v52 = vld.sshfl [vmem:[%s3686_s20 + $0x8] sm:$0x3 pattern:$0x76325410]  ;;  %v3349_v61 = vld [vmem:[%s4281_s5 + $0xf8] sm:$0xff]  }
  0x1b   : > { %2991 = vmatpush3.bf16.msra.mxu0 %v3316_v14  ;;  %v472_v44 = vrot.slane %v458_v40, %v464_v41  ;;  %v473_v45 = vcombine.high %v465_v43, %v465_v43  ;;  %v3345_v57 = vld [vmem:[%s4281_s5 + $0x68] sm:$0xff]   ;;  %v3347_v59 = vld [vmem:[%s4281_s5 + $0x60] sm:$0xff]   ;;  %v3350_v62 = vld [vmem:[%s4281_s5 + $0xb8] sm:$0xff]  }
  0x1c   : > { %3013 = vmatpush3.bf16.msra.mxu1 %v3317_v15  ;;  %2992 = vmatprep.subr.bf16.mxu0 %v3318_v16  ;;  %v3346_v58 = vld [vmem:[%s4281_s5 + $0x28] sm:$0xff]   ;;  %v3348_v60 = vld [vmem:[%s4281_s5 + $0x20] sm:$0xff]   ;;  %v3351_v1 = vld [vmem:[%s4281_s5 + $0x58] sm:$0xff]  }
  0x1d   : > { %3014 = vmatprep.subr.bf16.mxu1 %v3319_v17  ;;  %v474_v46 = vcombine.high %v472_v44, %v472_v44  ;;  %751 = vmatprep.mubr.bf16.mxu0 %v473_v45  ;;  %v3352_v2 = vld [vmem:[%s4281_s5 + $0x18] sm:$0xff]   ;;  %v3353_v3 = vld [vmem:[%s4281_s5 + $0xf0] sm:$0xff]   ;;  %v3357_v8 = vld [vmem:[%s4281_s5 + $0xe8] sm:$0xff]  }
  0x1e   : > { %v3354_v4 = vld [vmem:[%s4281_s5 + $0xb0] sm:$0xff]   ;;  %v3358_v9 = vld [vmem:[%s4281_s5 + $0xa8] sm:$0xff]   ;;  %v3361_v13 = vld [vmem:[%s4281_s5 + $0xe0] sm:$0xff]  }
  0x1f   : > { %2993 = vmatpush3.bf16.msra.mxu0 %v3320_v18  ;;  %791 = vmatprep.mubr.bf16.mxu1 %v474_v46  ;;  %v3355_v6 = vld [vmem:[%s4281_s5 + $0x50] sm:$0xff]   ;;  %v3359_v11 = vld [vmem:[%s4281_s5 + $0x48] sm:$0xff]   ;;  %v3362_v14 = vld [vmem:[%s4281_s5 + $0xa0] sm:$0xff]  }
  0x20   : > { %3015 = vmatpush3.bf16.msra.mxu1 %v3321_v19  ;;  %2994 = vmatprep.subr.bf16.mxu0 %v3322_v20  ;;  %v3356_v7 = vld [vmem:[%s4281_s5 + $0x10] sm:$0xff]   ;;  %v3360_v12 = vld [vmem:[%s4281_s5 + $0x8] sm:$0xff]   ;;  %v869_v15 = vld [vmem:[%s3797_s26] sm:$0xff] }
  0x21   : > { %3016 = vmatprep.subr.bf16.mxu1 %v3323_v21  ;;  %v3363_v16 = vld [vmem:[%s4281_s5 + $0x40] sm:$0xff]   ;;  %v3365_v18 = vld [vmem:[%s4281_s5 + $0xd8] sm:$0xff]   ;;  %v1183_v19 = vrot.slane %v869_v15, %v3782_v10  ;;  %v3375_v33 = vld [vmem:[%s4281_s5 + $0x168] sm:$0xff]   ;;  %v1176_v46 = vcombine.high %v869_v15, %v869_v15 }
  0x22   : > { %v3364_v17 = vld [vmem:[%s4281_s5] sm:$0xff]   ;;  %v3366_v20 = vld [vmem:[%s4281_s5 + $0x98] sm:$0xff]   ;;  %v3376_v37 = vld [vmem:[%s4281_s5 + $0x128] sm:$0xff]  }
  0x23   : > { %2995 = vmatpush3.bf16.msra.mxu0 %v3324_v22  ;;  %v3367_v21 = vld [vmem:[%s4281_s5 + $0x178] sm:$0xff]   ;;  %v1191_v22 = vcombine.high %v1183_v19, %v1183_v19  ;;  %v3377_v36 = vld [vmem:[%s4281_s5 + $0xc0] sm:$0xff]   ;;  %v3924_v5 = vld [vmem:[%s3797_s26 + $0x8] sm:$0xff] }
  0x24   : > { %3017 = vmatpush3.bf16.msra.mxu1 %v3325_v23  ;;  %2996 = vmatprep.subr.bf16.mxu0 %v3326_v24  ;;  %v3369_v23 = vld [vmem:[%s4281_s5 + $0xd0] sm:$0xff]   ;;  %v1199_v24 = vrot.slane %v1183_v19, %v3782_v10  ;;  %v3378_v38 = vld [vmem:[%s4281_s5 + $0x80] sm:$0xff]   ;;  %v3383_v45 = vld [vmem:[%s4281_s5 + $0x158] sm:$0xff]  }
  0x25   : > { %3018 = vmatprep.subr.bf16.mxu1 %v3327_v25  ;;  %v1213_v25 = vrot.slane %v1191_v22, %v3782_v10  ;;  %v3379_v39 = vld [vmem:[%s4281_s5 + $0x160] sm:$0xff]   ;;  %v3397_v63 = vld [vmem:[%s4281_s5 + $0x1d8] sm:$0xff]   ;;  %v3407_v15 = vld [vmem:[%s4281_s5 + $0x268] sm:$0xff]  }
  0x26   : > { %v3380_v40 = vld [vmem:[%s4281_s5 + $0x120] sm:$0xff]  }
  0x27   : > { %2997 = vmatpush3.bf16.msra.mxu0 %v3328_v26  ;;  %v3368_v26 = vld [vmem:[%s4281_s5 + $0x138] sm:$0xff]   ;;  %v1223_v41 = vcombine.high %v1213_v25, %v1213_v25  ;;  %v3396_v0 = vld [vmem:[%s4281_s5 + $0x100] sm:$0xff]  }
  0x28   : > { %3019 = vmatpush3.bf16.msra.mxu1 %v3329_v27  ;;  %2998 = vmatprep.subr.bf16.mxu0 %v3330_v28  ;;  %v3370_v27 = vld [vmem:[%s4281_s5 + $0x90] sm:$0xff]   ;;  %v3411_v19 = vld [vmem:[%s4281_s5 + $0x260] sm:$0xff]  }
  0x29   : > { %3020 = vmatprep.subr.bf16.mxu1 %v3331_v29  ;;  %v3371_v28 = vld [vmem:[%s4281_s5 + $0x170] sm:$0xff]   ;;  %v3373_v29 = vld [vmem:[%s4281_s5 + $0xc8] sm:$0xff]   ;;  %v3412_v22 = vld [vmem:[%s4281_s5 + $0x220] sm:$0xff]  }
  0x2b   : > { %2999 = vmatpush3.bf16.msra.mxu0 %v3332_v31  ;;  %v3372_v31 = vld [vmem:[%s4281_s5 + $0x130] sm:$0xff]  }
  0x2c   : > { %3021 = vmatpush3.bf16.msra.mxu1 %v3333_v32  ;;  %3240 = vmatprep.subr.bf16.mxu0 %v3516_v35  ;;  %v3374_v32 = vld [vmem:[%s4281_s5 + $0x88] sm:$0xff]  }
  0x2d   : > { %3035 = vmatprep.subr.bf16.mxu1 %v3341_v53 }
  0x2e   : > { %752 = vmatmul.mubr.bf16.vlgmr.msra.gmra.mxu0 %v465_v43  ;;  %v1221_v43 = vcombine.high %v1199_v24, %v1199_v24 }
  0x2f   : > { %792 = vmatmul.mubr.bf16.vlgmr.msra.gmra.mxu1 %v472_v44  ;;  %3241 = vmatpush3.bf16.msra.mxu0 %v717_v42  ;;  %v3381_v42 = vld [vmem:[%s4281_s5 + $0x1f8] sm:$0xff]  }
  0x30   : > { %3252 = vmatprep.mubr.msk.bf16.mxu0 %vm3518_vm1, %v3516_v35  ;;  %3242 = vmatprep.subr.bf16.mxu0 %v3516_v35  ;;  %v3382_v44 = vld [vmem:[%s4281_s5 + $0x1b8] sm:$0xff]  }
  0x31   : > { %3036 = vmatpush3.bf16.msra.mxu1 %v3342_v54  ;;  %2251 = vmatprep.mubr.bf16.mxu1 %v1213_v25  ;;  %v3388_v54 = vld [vmem:[%s4281_s5 + $0x110] sm:$0xff]   ;;  %v3414_v25 = vld [vmem:[%s4281_s5 + $0x2b8] sm:$0xff]  }
  0x32   : > { %3037 = vmatprep.subr.bf16.mxu1 %v3343_v55  ;;  %v3391_v55 = vld [vmem:[%s4281_s5 + $0x148] sm:$0xff]  }
  0x33   : > { %3243 = vmatpush3.bf16.msra.mxu0 %v3336_v47  ;;  %v3384_v47 = vld [vmem:[%s4281_s5 + $0x118] sm:$0xff]  }
  0x34   : > { %3244 = vmatprep.subr.bf16.mxu0 %v3516_v35 }
  0x35   : > { %3038 = vmatpush3.bf16.msra.mxu1 %v3344_v56 }
  0x36   : > { %3039 = vmatprep.subr.bf16.mxu1 %v3345_v57  ;;  %v3390_v57 = vld [vmem:[%s4281_s5 + $0x1a8] sm:$0xff]  }
  0x37   : > { %3245 = vmatpush3.bf16.msra.mxu0 %v3337_v48  ;;  %v3385_v48 = vld [vmem:[%s4281_s5 + $0x1f0] sm:$0xff]  }
  0x38   : > { %3246 = vmatprep.subr.bf16.mxu0 %v3516_v35 }
  0x39   : > { %3040 = vmatpush3.bf16.msra.mxu1 %v3346_v58  ;;  %v3393_v58 = vld [vmem:[%s4281_s5 + $0x1e0] sm:$0xff]  }
  0x3a   : > { %3041 = vmatprep.subr.bf16.mxu1 %v3347_v59 }
  0x3b   : > { %3247 = vmatpush3.bf16.msra.mxu0 %v3338_v49  ;;  %v3387_v49 = vld [vmem:[%s4281_s5 + $0x150] sm:$0xff]  }
  0x3c   : > { %3248 = vmatprep.subr.bf16.mxu0 %v3516_v35 }
  0x3d   : > { %3042 = vmatpush3.bf16.msra.mxu1 %v3348_v60  ;;  %v3392_v60 = vld [vmem:[%s4281_s5 + $0x108] sm:$0xff]  }
  0x3e   : > { %3043 = vmatprep.subr.bf16.mxu1 %v3351_v1  ;;  %v3399_v1 = vld [vmem:[%s4281_s5 + $0x278] sm:$0xff]  }
  0x3f   : > { %3249 = vmatpush3.bf16.msra.mxu0 %v3339_v50  ;;  %v1190_v50 = vrot.slane %v1176_v46, %v3782_v10  ;;  %v3427_v46 = vld [vmem:[%s4281_s5 + $0x240] sm:$0xff]  }
  0x40   : > { %3250 = vmatprep.subr.bf16.mxu0 %v3516_v35 }
  0x41   : > { %3044 = vmatpush3.bf16.msra.mxu1 %v3352_v2  ;;  %v1192_v53 = vcombine.high %v1190_v50, %v1190_v50  ;;  %v3398_v2 = vld [vmem:[%s4281_s5 + $0x198] sm:$0xff]  }
  0x42   : > { %3045 = vmatprep.subr.bf16.mxu1 %v3355_v6  ;;  %v3400_v6 = vld [vmem:[%s4281_s5 + $0x238] sm:$0xff]  }
  0x43   : > { %3251 = vmatpush3.bf16.msra.mxu0 %v3340_v51  ;;  %v3386_v51 = vld [vmem:[%s4281_s5 + $0x1b0] sm:$0xff]   ;;  %v1220_v56 = vrot.slane %v1192_v53, %v3782_v10 }
  0x44   : > { %3057 = vmatprep.subr.bf16.mxu0 %v3349_v61  ;;  %v3395_v61 = vld [vmem:[%s4281_s5 + $0x140] sm:$0xff]  }
  0x45   : > { %3046 = vmatpush3.bf16.msra.mxu1 %v3356_v7  ;;  %v1224_v59 = vcombine.high %v1220_v56, %v1220_v56  ;;  %v3931_v7 = vrot.slane %v3924_v5, %v3782_v10 }
  0x46   : > { %3253 = vmatmul.mubr.msk.bf16.vlgmr.msra.gmra.mxu0 %vm711_vm2, %v2790_v52  ;;  %3047 = vmatprep.subr.bf16.mxu1 %v3359_v11  ;;  %v3389_v52 = vld [vmem:[%s4281_s5 + $0x1e8] sm:$0xff]  }
  0x47   : > { %3058 = vmatpush3.bf16.msra.mxu0 %v3350_v62  ;;  %2291 = vmatprep.mubr.bf16.mxu0 %v1223_v41  ;;  %v3394_v62 = vld [vmem:[%s4281_s5 + $0x1a0] sm:$0xff]   ;;  %v1240_v11 = vcombine.high %v3931_v7, %v3931_v7  ;;  %v3422_v41 = vld [vmem:[%s4281_s5 + $0x2a8] sm:$0xff]   ;;  %v1248_v53 = vrot.slane %v3931_v7, %v3782_v10  ;;  %v3446_v7 = vld [vmem:[%s4281_s5 + $0x3b8] sm:$0xff]  }
  0x48   : > { %3059 = vmatprep.subr.bf16.mxu0 %v3353_v3  ;;  %v1206_v3 = vrot.slane %v1190_v50, %v3782_v10 }
  0x49   : > { %3048 = vmatpush3.bf16.msra.mxu1 %v3360_v12  ;;  %v3405_v12 = vld [vmem:[%s4281_s5 + $0x1c8] sm:$0xff]  }
  0x4a   : > { %3049 = vmatprep.subr.bf16.mxu1 %v3363_v16  ;;  %v3406_v16 = vld [vmem:[%s4281_s5 + $0x188] sm:$0xff]  }
  0x4b   : > { %3060 = vmatpush3.bf16.msra.mxu0 %v3354_v4  ;;  %v3401_v4 = vld [vmem:[%s4281_s5 + $0x1d0] sm:$0xff]  }
  0x4c   : > { %3061 = vmatprep.subr.bf16.mxu0 %v3357_v8  ;;  %v3403_v8 = vld [vmem:[%s4281_s5 + $0x270] sm:$0xff]  }
  0x4d   : > { %3050 = vmatpush3.bf16.msra.mxu1 %v3364_v17  ;;  %v3409_v17 = vld [vmem:[%s4281_s5 + $0x1c0] sm:$0xff]  }
  0x4e   : > { %3079 = vmatprep.subr.bf16.mxu1 %v3367_v21  ;;  %v3413_v21 = vld [vmem:[%s4281_s5 + $0x2f8] sm:$0xff]  }
  0x4f   : > { %3062 = vmatpush3.bf16.msra.mxu0 %v3358_v9  ;;  %v3402_v9 = vld [vmem:[%s4281_s5 + $0x190] sm:$0xff]  }
  0x50   : > { %3063 = vmatprep.subr.bf16.mxu0 %v3361_v13  ;;  %2252 = vmatmul.mubr.bf16.vlgmr.msra.gmra.mxu1 %v1199_v24  ;;  %v3404_v13 = vld [vmem:[%s4281_s5 + $0x230] sm:$0xff]   ;;  %v3415_v24 = vld [vmem:[%s4281_s5 + $0x258] sm:$0xff]  }
  0x51   : > { %3080 = vmatpush3.bf16.msra.mxu1 %v3368_v26  ;;  %2331 = vmatprep.mubr.bf16.mxu1 %v1220_v56 }
  0x52   : > { %3081 = vmatprep.subr.bf16.mxu1 %v3371_v28  ;;  %v3416_v28 = vld [vmem:[%s4281_s5 + $0x218] sm:$0xff]  }
  0x53   : > { %3064 = vmatpush3.bf16.msra.mxu0 %v3362_v14  ;;  %v1262_v14 = vrot.slane %v1240_v11, %v3782_v10  ;;  %v3448_v11 = vld [vmem:[%s4281_s5 + $0x318] sm:$0xff]  }
  0x54   : > { %3065 = vmatprep.subr.bf16.mxu0 %v3365_v18  ;;  %v3408_v18 = vld [vmem:[%s4281_s5 + $0x228] sm:$0xff]  }
  0x55   : > { %3082 = vmatpush3.bf16.msra.mxu1 %v3372_v31  ;;  %v1272_v26 = vcombine.high %v1262_v14, %v1262_v14  ;;  %v3418_v31 = vld [vmem:[%s4281_s5 + $0x2b0] sm:$0xff]  }
  0x56   : > { %3083 = vmatprep.subr.bf16.mxu1 %v3375_v33  ;;  %v2830_v33 = vld.sshfl [vmem:[%s3797_s26 + $0x10] sm:$0x13 pattern:$0x75316420]  ;;  %s2789_s26 = sshll.u32 %s4290_s27, 3 }
  0x57   : > { %3066 = vmatpush3.bf16.msra.mxu0 %v3366_v20  ;;  %v3410_v20 = vld [vmem:[%s4281_s5 + $0x180] sm:$0xff]   ;;  %s377_s15 = scalar_lea.vmem %s4284_s8, %s2789_s26 }
  0x58   : > { %3067 = vmatprep.subr.bf16.mxu0 %v3369_v23  ;;  %v1222_v23 = vcombine.high %v1206_v3, %v1206_v3 }
  0x59   : > { %3084 = vmatpush3.bf16.msra.mxu1 %v3376_v37  ;;  %v1225_v37 = vcombine.high %v3924_v5, %v3924_v5  ;;  %v1270_v5 = vcombine.high %v1248_v53, %v1248_v53 }
  0x5a   : > { %3085 = vmatprep.subr.bf16.mxu1 %v3379_v39  ;;  %v4000_v39 = vrot.slane %v2830_v33, %v3782_v10 }
  0x5b   : > { %3068 = vmatpush3.bf16.msra.mxu0 %v3370_v27  ;;  %v3417_v27 = vld [vmem:[%s4281_s5 + $0x2f0] sm:$0xff]  }
  0x5c   : > { %3069 = vmatprep.subr.bf16.mxu0 %v3373_v29  ;;  %v3419_v29 = vld [vmem:[%s4281_s5 + $0x250] sm:$0xff]  }
  0x5d   : > { %3086 = vmatpush3.bf16.msra.mxu1 %v3380_v40  ;;  %v3423_v40 = vld [vmem:[%s4281_s5 + $0x248] sm:$0xff]  }
  0x5e   : > { %3087 = vmatprep.subr.bf16.mxu1 %v3383_v45  ;;  %v4018_v45 = vrot.slane %v1225_v37, %v3782_v10 }
  0x5f   : > { %3070 = vmatpush3.bf16.msra.mxu0 %v3374_v32  ;;  %v3421_v32 = vld [vmem:[%s4281_s5 + $0x2e8] sm:$0xff]  }
  0x60   : > { %3071 = vmatprep.subr.bf16.mxu0 %v3377_v36  ;;  %v3420_v36 = vld [vmem:[%s4281_s5 + $0x210] sm:$0xff]   ;;  %v1241_v50 = vcombine.high %v4018_v45, %v4018_v45  ;;  %v1255_v37 = vrot.slane %v4018_v45, %v3782_v10  ;;  %v3472_v45 = vld [vmem:[%s4281_s5 + $0x468] sm:$0xff]  }
  0x61   : > { %3088 = vmatpush3.bf16.msra.mxu1 %v3384_v47  ;;  %v3426_v47 = vld [vmem:[%s4281_s5 + $0x2a0] sm:$0xff]  }
  0x62   : > { %3089 = vmatprep.subr.bf16.mxu1 %v3387_v49  ;;  %v3428_v49 = vld [vmem:[%s4281_s5 + $0x200] sm:$0xff]   ;;  %v1269_v56 = vrot.slane %v1241_v50, %v3782_v10 }
  0x63   : > { %3072 = vmatpush3.bf16.msra.mxu0 %v3378_v38  ;;  %v1281_v38 = vcombine.high %v2830_v33, %v2830_v33  ;;  %v3464_v33 = vld [vmem:[%s4281_s5 + $0x478] sm:$0xff]   ;;  %v3476_v50 = vld [vmem:[%s4281_s5 + $0x460] sm:$0xff]  }
  0x64   : > { %3101 = vmatprep.subr.bf16.mxu0 %v3381_v42 }
  0x65   : > { %3090 = vmatpush3.bf16.msra.mxu1 %v3388_v54  ;;  %v4009_v42 = vrot.slane %v1281_v38, %v3782_v10  ;;  %v3433_v54 = vld [vmem:[%s4281_s5 + $0x2d0] sm:$0xff]   ;;  %v3470_v10 = vld [vmem:[%s4281_s5 + $0x3c8] sm:$0xff]  }
  0x66   : > { %2292 = vmatmul.mubr.bf16.vlgmr.msra.gmra.mxu0 %v1221_v43  ;;  %3091 = vmatprep.subr.bf16.mxu1 %v3391_v55  ;;  %v3425_v43 = vld [vmem:[%s4281_s5 + $0x2e0] sm:$0xff]   ;;  %v3432_v55 = vld [vmem:[%s4281_s5 + $0x338] sm:$0xff]   ;;  %v3466_v38 = vld [vmem:[%s4281_s5 + $0x3d0] sm:$0xff]  }
  0x67   : > { %3102 = vmatpush3.bf16.msra.mxu0 %v3382_v44  ;;  %2371 = vmatprep.mubr.bf16.mxu0 %v1224_v59  ;;  %v3424_v44 = vld [vmem:[%s4281_s5 + $0x208] sm:$0xff]  }
  0x68   : > { %3103 = vmatprep.subr.bf16.mxu0 %v3385_v48  ;;  %v3429_v48 = vld [vmem:[%s4281_s5 + $0x2d8] sm:$0xff]   ;;  %v3437_v59 = vld [vmem:[%s4281_s5 + $0x2c8] sm:$0xff]  }
  0x69   : > { %3092 = vmatpush3.bf16.msra.mxu1 %v3392_v60  ;;  %v3436_v60 = vld [vmem:[%s4281_s5 + $0x330] sm:$0xff]  }
  0x6a   : > { %3093 = vmatprep.subr.bf16.mxu1 %v3395_v61  ;;  %v3439_v61 = vld [vmem:[%s4281_s5 + $0x368] sm:$0xff]  }
  0x6b   : > { %3104 = vmatpush3.bf16.msra.mxu0 %v3386_v51  ;;  %v3431_v51 = vld [vmem:[%s4281_s5 + $0x378] sm:$0xff]  }
  0x6c   : > { %3105 = vmatprep.subr.bf16.mxu0 %v3389_v52  ;;  %v3430_v52 = vld [vmem:[%s4281_s5 + $0x298] sm:$0xff]  }
  0x6d   : > { %3094 = vmatpush3.bf16.msra.mxu1 %v3396_v0  ;;  %v3440_v0 = vld [vmem:[%s4281_s5 + $0x328] sm:$0xff]  }
  0x6e   : > { %3123 = vmatprep.subr.bf16.mxu1 %v3399_v1  ;;  %v3443_v1 = vld [vmem:[%s4281_s5 + $0x360] sm:$0xff]  }
  0x6f   : > { %3106 = vmatpush3.bf16.msra.mxu0 %v3390_v57  ;;  %v3435_v57 = vld [vmem:[%s4281_s5 + $0x370] sm:$0xff]  }
  0x70   : > { %3107 = vmatprep.subr.bf16.mxu0 %v3393_v58  ;;  %2332 = vmatmul.mubr.bf16.vlgmr.msra.gmra.mxu1 %v1206_v3  ;;  %v3434_v58 = vld [vmem:[%s4281_s5 + $0x290] sm:$0xff]   ;;  %v3445_v3 = vld [vmem:[%s4281_s5 + $0x3f8] sm:$0xff]  }
  0x71   : > { %3124 = vmatpush3.bf16.msra.mxu1 %v3400_v6  ;;  %2411 = vmatprep.mubr.bf16.mxu1 %v1262_v14  ;;  %v3447_v6 = vld [vmem:[%s4281_s5 + $0x358] sm:$0xff]   ;;  %v3453_v14 = vld [vmem:[%s4281_s5 + $0x3e8] sm:$0xff]  }
  0x72   : > { %3125 = vmatprep.subr.bf16.mxu1 %v3403_v8  ;;  %v1273_v8 = vcombine.high %v1269_v56, %v1269_v56 }
  0x73   : > { %3108 = vmatpush3.bf16.msra.mxu0 %v3394_v62  ;;  %v3438_v62 = vld [vmem:[%s4281_s5 + $0x288] sm:$0xff]  }
  0x74   : > { %3109 = vmatprep.subr.bf16.mxu0 %v3397_v63  ;;  %v3441_v63 = vld [vmem:[%s4281_s5 + $0x2c0] sm:$0xff]  }
  0x75   : > { %3126 = vmatpush3.bf16.msra.mxu1 %v3404_v13  ;;  %v3450_v13 = vld [vmem:[%s4281_s5 + $0x3b0] sm:$0xff]  }
  0x76   : > { %3127 = vmatprep.subr.bf16.mxu1 %v3407_v15 }
  0x77   : > { %3110 = vmatpush3.bf16.msra.mxu0 %v3398_v2  ;;  %v3442_v2 = vld [vmem:[%s4281_s5 + $0x280] sm:$0xff]  }
  0x78   : > { %3111 = vmatprep.subr.bf16.mxu0 %v3401_v4  ;;  %v3444_v4 = vld [vmem:[%s4281_s5 + $0x320] sm:$0xff]  }
  0x79   : > { %3128 = vmatpush3.bf16.msra.mxu1 %v3408_v18  ;;  %v3455_v18 = vld [vmem:[%s4281_s5 + $0x348] sm:$0xff]  }
  0x7a   : > { %3129 = vmatprep.subr.bf16.mxu1 %v3411_v19 }
  0x7b   : > { %3112 = vmatpush3.bf16.msra.mxu0 %v3402_v9  ;;  %v3449_v9 = vld [vmem:[%s4281_s5 + $0x3f0] sm:$0xff]  }
  0x7c   : > { %3113 = vmatprep.subr.bf16.mxu0 %v3405_v12  ;;  %v3451_v12 = vld [vmem:[%s4281_s5 + $0x350] sm:$0xff]  }
  0x7d   : > { %3130 = vmatpush3.bf16.msra.mxu1 %v3412_v22  ;;  %v3457_v22 = vld [vmem:[%s4281_s5 + $0x3e0] sm:$0xff]  }
  0x7e   : > { %3131 = vmatprep.subr.bf16.mxu1 %v3415_v24 }
  0x7f   : > { %3114 = vmatpush3.bf16.msra.mxu0 %v3406_v16 }
  0x80   : > { %3115 = vmatprep.subr.bf16.mxu0 %v3409_v17  ;;  %v3452_v17 = vld [vmem:[%s4281_s5 + $0x310] sm:$0xff]  }
  0x81   : > { %3132 = vmatpush3.bf16.msra.mxu1 %v3416_v28 }
  0x82   : > { %3133 = vmatprep.subr.bf16.mxu1 %v3419_v29  ;;  %v3458_v29 = vld [vmem:[%s4281_s5 + $0x3a0] sm:$0xff]  }
  0x83   : > { %3116 = vmatpush3.bf16.msra.mxu0 %v3410_v20 }
  0x84   : > { %3145 = vmatprep.subr.bf16.mxu0 %v3413_v21  ;;  %v3454_v21 = vld [vmem:[%s4281_s5 + $0x3a8] sm:$0xff]  }
  0x85   : > { %3134 = vmatpush3.bf16.msra.mxu1 %v3420_v36  ;;  %v3462_v36 = vld [vmem:[%s4281_s5 + $0x398] sm:$0xff]  }
  0x86   : > { %2372 = vmatmul.mubr.bf16.vlgmr.msra.gmra.mxu0 %v1222_v23  ;;  %3135 = vmatprep.subr.bf16.mxu1 %v3423_v40  ;;  %v3465_v40 = vld [vmem:[%s4281_s5 + $0x438] sm:$0xff]  }
  0x87   : > { %3146 = vmatpush3.bf16.msra.mxu0 %v3414_v25  ;;  %2451 = vmatprep.mubr.bf16.mxu0 %v1272_v26  ;;  %v3456_v25 = vld [vmem:[%s4281_s5 + $0x308] sm:$0xff]   ;;  %v3459_v26 = vld [vmem:[%s4281_s5 + $0x340] sm:$0xff]  }
  0x88   : > { %3147 = vmatprep.subr.bf16.mxu0 %v3417_v27 }
  0x89   : > { %3136 = vmatpush3.bf16.msra.mxu1 %v3424_v44  ;;  %v3469_v44 = vld [vmem:[%s4281_s5 + $0x430] sm:$0xff]  }
  0x8a   : > { %3137 = vmatprep.subr.bf16.mxu1 %v3427_v46  ;;  %v3471_v46 = vld [vmem:[%s4281_s5 + $0x388] sm:$0xff]  }
  0x8b   : > { %3148 = vmatpush3.bf16.msra.mxu0 %v3418_v31  ;;  %v3461_v31 = vld [vmem:[%s4281_s5 + $0x3d8] sm:$0xff]  }
  0x8c   : > { %3149 = vmatprep.subr.bf16.mxu0 %v3421_v32  ;;  %v3460_v32 = vld [vmem:[%s4281_s5 + $0x300] sm:$0xff]  }
  0x8d   : > { %3138 = vmatpush3.bf16.msra.mxu1 %v3428_v49  ;;  %v3474_v49 = vld [vmem:[%s4281_s5 + $0x3c0] sm:$0xff]  }
  0x8e   : > { %3167 = vmatprep.subr.bf16.mxu1 %v3431_v51  ;;  %v3475_v51 = vld [vmem:[%s4281_s5 + $0x380] sm:$0xff]  }
  0x8f   : > { %3150 = vmatpush3.bf16.msra.mxu0 %v3422_v41  ;;  %v3468_v41 = vld [vmem:[%s4281_s5 + $0x470] sm:$0xff]  }
  0x90   : > { %3151 = vmatprep.subr.bf16.mxu0 %v3425_v43  ;;  %2412 = vmatmul.mubr.bf16.vlgmr.msra.gmra.mxu1 %v1248_v53  ;;  %v3467_v43 = vld [vmem:[%s4281_s5 + $0x390] sm:$0xff]  }
  0x91   : > { %3168 = vmatpush3.bf16.msra.mxu1 %v3432_v55  ;;  %2491 = vmatprep.mubr.bf16.mxu1 %v1269_v56  ;;  %v1271_v56 = vcombine.high %v1255_v37, %v1255_v37 }
  0x92   : > { %3169 = vmatprep.subr.bf16.mxu1 %v3435_v57  ;;  %v3479_v57 = vld [vmem:[%s4281_s5 + $0x458] sm:$0xff]  }
  0x93   : > { %3152 = vmatpush3.bf16.msra.mxu0 %v3426_v47 }
  0x94   : > { %3153 = vmatprep.subr.bf16.mxu0 %v3429_v48 }
  0x95   : > { %3170 = vmatpush3.bf16.msra.mxu1 %v3436_v60 }
  0x96   : > { %3171 = vmatprep.subr.bf16.mxu1 %v3439_v61 }
  0x97   : > { %3154 = vmatpush3.bf16.msra.mxu0 %v3430_v52 }
  0x98   : > { %3155 = vmatprep.subr.bf16.mxu0 %v3433_v54  ;;  %v3477_v54 = vld [vmem:[%s4281_s5 + $0x420] sm:$0xff]  }
  0x99   : > { %3172 = vmatpush3.bf16.msra.mxu1 %v3440_v0  ;;  %v3480_v0 = vld [vmem:[%s4281_s5 + $0x418] sm:$0xff]  }
  0x9a   : > { %3173 = vmatprep.subr.bf16.mxu1 %v3443_v1 }
  0x9b   : > { %3156 = vmatpush3.bf16.msra.mxu0 %v3434_v58 }
  0x9c   : > { %3157 = vmatprep.subr.bf16.mxu0 %v3437_v59  ;;  %v3478_v59 = vld [vmem:[%s4281_s5 + $0x4a8] sm:$0xff]  }
  0x9d   : > { %3174 = vmatpush3.bf16.msra.mxu1 %v3444_v4 }
  0x9e   : > { %3175 = vmatprep.subr.bf16.mxu1 %v3447_v6  ;;  %v3481_v6 = vld [vmem:[%s4281_s5 + $0x4a0] sm:$0xff]  }
  0x9f   : > { %3158 = vmatpush3.bf16.msra.mxu0 %v3438_v62 }
  0xa0   : > { %3159 = vmatprep.subr.bf16.mxu0 %v3441_v63 }
  0xa1   : > { %3176 = vmatpush3.bf16.msra.mxu1 %v3448_v11  ;;  %v3485_v11 = vld [vmem:[%s4281_s5 + $0x448] sm:$0xff]  }
  0xa2   : > { %3177 = vmatprep.subr.bf16.mxu1 %v3451_v12 }
  0xa3   : > { %3160 = vmatpush3.bf16.msra.mxu0 %v3442_v2  ;;  %v3482_v2 = vld [vmem:[%s4281_s5 + $0x450] sm:$0xff]  }
  0xa4   : > { %3189 = vmatprep.subr.bf16.mxu0 %v3445_v3 }
  0xa5   : > { %3178 = vmatpush3.bf16.msra.mxu1 %v3452_v17  ;;  %v3486_v17 = vld [vmem:[%s4281_s5 + $0x408] sm:$0xff]  }
  0xa6   : > { %2452 = vmatmul.mubr.bf16.vlgmr.msra.gmra.mxu0 %v1270_v5  ;;  %3179 = vmatprep.subr.bf16.mxu1 %v3455_v18  ;;  %v846_v18 = vld [vmem:[#allocation2] sm:$0x1] }
  0xa7   : > { %3190 = vmatpush3.bf16.msra.mxu0 %v3446_v7  ;;  %2531 = vmatprep.mubr.bf16.mxu0 %v1273_v8 }
  0xa8   : > { %3191 = vmatprep.subr.bf16.mxu0 %v3449_v9  ;;  %v3483_v9 = vld [vmem:[%s4281_s5 + $0x410] sm:$0xff]  }
  0xa9   : > { %3180 = vmatpush3.bf16.msra.mxu1 %v3456_v25 }
  0xaa   : > { %3181 = vmatprep.subr.bf16.mxu1 %v3459_v26  ;;  %v3489_v26 = vld [vmem:[%s4281_s5 + $0x400] sm:$0xff]  }
  0xab   : > { %3192 = vmatpush3.bf16.msra.mxu0 %v3450_v13 }
  0xac   : > { %3193 = vmatprep.subr.bf16.mxu0 %v3453_v14  ;;  %v3484_v14 = vld [vmem:[%s4281_s5 + $0x498] sm:$0xff]  }
  0xad   : > { %3182 = vmatpush3.bf16.msra.mxu1 %v3460_v32  ;;  %v2627_v32 = vld [vmem:[%s4279_s3] sm:$0x1] }
  0xae   : > { %3211 = vmatprep.subr.bf16.mxu1 %v3464_v33  ;;  %v2630_v33 = vld [vmem:[%s4280_s4] sm:$0x1] }
  0xaf   : > { %3194 = vmatpush3.bf16.msra.mxu0 %v3454_v21 }
  0xb0   : > { %3195 = vmatprep.subr.bf16.mxu0 %v3457_v22  ;;  %2492 = vmatmul.mubr.bf16.vlgmr.msra.gmra.mxu1 %v1255_v37  ;;  %v3487_v22 = vld [vmem:[%s4281_s5 + $0x490] sm:$0xff]  }
  0xb1   : > { %3212 = vmatpush3.bf16.msra.mxu1 %v3465_v40  ;;  %2571 = vmatprep.mubr.bf16.mxu1 %v4009_v42  ;;  %v3473_v42 = vld [vmem:[%s4281_s5 + $0x428] sm:$0xff]  }
  0xb2   : > { %3213 = vmatprep.subr.bf16.mxu1 %v3468_v41 }
  0xb3   : > { %3196 = vmatpush3.bf16.msra.mxu0 %v3458_v29  ;;  %v3491_v29 = vld [vmem:[%s4281_s5 + $0x480] sm:$0xff]  }
  0xb4   : > { %3197 = vmatprep.subr.bf16.mxu0 %v3461_v31 }
  0xb5   : > { %3214 = vmatpush3.bf16.msra.mxu1 %v3469_v44 }
  0xb6   : > { %3215 = vmatprep.subr.bf16.mxu1 %v3472_v45 }
  0xb7   : > { %3198 = vmatpush3.bf16.msra.mxu0 %v3462_v36  ;;  %v1296_v36 = vcombine.high %v4000_v39, %v4000_v39 }
  0xb8   : > { %3199 = vmatprep.subr.bf16.mxu0 %v3466_v38 }
  0xb9   : > { %3216 = vmatpush3.bf16.msra.mxu1 %v3473_v42 }
  0xba   : > { %3217 = vmatprep.subr.bf16.mxu1 %v3476_v50 }
  0xbb   : > { %3200 = vmatpush3.bf16.msra.mxu0 %v3467_v43  ;;  %v2631_v43 = vmul.f32 4.0, %v2630_v33 }
  0xbc   : > { %3201 = vmatprep.subr.bf16.mxu0 %v3470_v10 }
  0xbd   : > { %3218 = vmatpush3.bf16.msra.mxu1 %v3477_v54 }
  0xbe   : > { %3219 = vmatprep.subr.bf16.mxu1 %v3479_v57 }
  0xbf   : > { %3202 = vmatpush3.bf16.msra.mxu0 %v3471_v46 }
  0xc0   : > { %3203 = vmatprep.subr.bf16.mxu0 %v3474_v49 }
  0xc1   : > { %3220 = vmatpush3.bf16.msra.mxu1 %v3480_v0 }
  0xc2   : > { %3221 = vmatprep.subr.bf16.mxu1 %v3482_v2 }
  0xc3   : > { %3204 = vmatpush3.bf16.msra.mxu0 %v3475_v51 }
  0xc4   : > { %3256 = vmatprep.subr.bf16.mxu0 %v3516_v35 }
  0xc5   : > { %3222 = vmatpush3.bf16.msra.mxu1 %v3483_v9 }
  0xc6   : > { %2532 = vmatmul.mubr.bf16.vlgmr.msra.gmra.mxu0 %v1271_v56  ;;  %3223 = vmatprep.subr.bf16.mxu1 %v3485_v11 }
  0xc7   : > { %3257 = vmatpush3.bf16.msra.mxu0 %v3478_v59  ;;  %3268 = vmatprep.mubr.msk.bf16.mxu0 %vm3518_vm1, %v3516_v35 }
  0xc8   : > { %3258 = vmatprep.subr.bf16.mxu0 %v3516_v35 }
  0xc9   : > { %3224 = vmatpush3.bf16.msra.mxu1 %v3486_v17 }
  0xcb   : > { %3259 = vmatpush3.bf16.msra.mxu0 %v3481_v6 }
  0xcc   : > { %3260 = vmatprep.subr.bf16.mxu0 %v3516_v35 }
  0xcf   : > { %3261 = vmatpush3.bf16.msra.mxu0 %v3484_v14 }
  0xd0   : > { %3262 = vmatprep.subr.bf16.mxu0 %v3516_v35 }
  0xd3   : > { %3263 = vmatpush3.bf16.msra.mxu0 %v3487_v22 }
  0xd4   : > { %3264 = vmatprep.subr.bf16.mxu0 %v3516_v35 }
  0xee   : > { %v3000_v15 = vpop.f32.mrf.mxu0 }
  0xef   : > { %v3022_v16 = vpop.f32.mrf.mxu1 }
  0xf0   : > { %v3001_v19 = vpop.f32.mrf.mxu0 }
  0xf1   : > { %v3023_v20 = vpop.f32.mrf.mxu1  ;;  %v3002_v47 = vadd.f32 %v3001_v19, %v3000_v15  ;;  %v3488_v19 = vld [vmem:[%s4281_s5 + $0x440] sm:$0xff]  }
  0xf2   : > { %v3003_v23 = vpop.f32.mrf.mxu0  ;;  %v3024_v48 = vadd.f32 %v3023_v20, %v3022_v16  ;;  %3225 = vmatprep.subr.bf16.mxu1 %v3488_v19 }
  0xf3   : > { %v3025_v24 = vpop.f32.mrf.mxu1  ;;  %v858_v23 = vld [vmem:[#allocation3] sm:$0x1]  ;;  %3226 = vmatpush3.bf16.msra.mxu1 %v3489_v26 }
  0xf4   : > { %v3004_v27 = vpop.f32.mrf.mxu0  ;;  %v794_v52 = vadd.f32 %v3024_v48, %v3002_v47 }
  0xf5   : > { %v3026_v28 = vpop.f32.mrf.mxu1 }
  0xf6   : > { %v3490_v28 = vld [vmem:[%s4281_s5 + $0x488] sm:$0xff]   ;;  %2572 = vmatmul.mubr.bf16.vlgmr.msra.gmra.mxu1 %v4000_v39  ;;  %v2637_v39 = vand.u32 127, %v462_v30 }
  0xf7   : > { %3265 = vmatpush3.bf16.msra.mxu0 %v3490_v28 }
  0xf8   : > { %3266 = vmatprep.subr.bf16.mxu0 %v3516_v35 }
  0xfb   : > { %3267 = vmatpush3.bf16.msra.mxu0 %v3491_v29 }
  0xfe   : > { %3269 = vmatmul.mubr.msk.bf16.vlgmr.msra.gmra.mxu0 %vm2215_vm5, %v1296_v36 }
 0x106   : > { %v833_v53 = vpop.f32.mrf.mxu0 }
 0x107   : > { %v834_v55 = vadd.f32 %v833_v53, %v794_v52 }
 0x108   : > { %v3254_v58 = vpop.f32.mrf.mxu0 }
 0x109   : > { %v848_v60 = vsel %vm847_vm4, %v834_v55, 0.0  ;;  %v859_v61 = vmul.f32 %v834_v55, %v834_v55  ;;  %v1172_v55 = vld [vmem:[%s4282_s6] sm:$0x1] }
 0x10a   : > { %v849_v62 = vrot.slane %v848_v60, 4  ;;  %v836_v63 = vpop.f32.mrf.mxu0 }
 0x10b   : > { %v860_v1 = vsel %vm847_vm4, %v859_v61, 0.0 }
 0x10c   : > { %v850_v3 = vadd.f32 %v849_v62, %v848_v60  ;;  %v861_v4 = vrot.slane %v860_v1, 4  ;;  %v3255_v5 = vpop.f32.mrf.mxu0 }
 0x10e   : > { %v851_v7 = vrot.slane %v850_v3, 2  ;;  %v862_v8 = vadd.f32 %v861_v4, %v860_v1 }
 0x110   : > { %v852_v12 = vadd.f32 %v851_v7, %v850_v3  ;;  %v863_v13 = vrot.slane %v862_v8, 2  ;;  %v3051_v45 = vpop.f32.mrf.mxu1 }
 0x112   : > { %v853_v15 = vrot.slane %v852_v12, 1  ;;  %v864_v16 = vadd.f32 %v863_v13, %v862_v8  ;;  %v3052_v46 = vpop.f32.mrf.mxu1 }
 0x113   : > { %v3053_v47 = vadd.f32 %v3052_v46, %v3051_v45 }
 0x114   : > { %v854_v20 = vadd.f32 %v853_v15, %v852_v12  ;;  %v865_v21 = vrot.slane %v864_v16, 1  ;;  %v3054_v48 = vpop.f32.mrf.mxu1 }
 0x115   : > { %v2254_v56 = vadd.f32 %v3053_v47, %v1172_v55  ;;  %v2657_v55 = vsub.s32 0, %v3693_v34 }
 0x116   : > { %v866_v24 = vadd.f32 %v865_v21, %v864_v16  ;;  %v855_v25 = vadd.f32 %v854_v20, %v846_v18  ;;  %v3055_v49 = vpop.f32.mrf.mxu1 }
 0x118   : > { %857 = vst.msk [vmem:[#allocation2] sm:$0x1] %vm843_vm3, %v855_v25  ;;  %v867_v27 = vadd.f32 %v866_v24, %v858_v23 }
 0x11a   : > { %868 = vst.msk [vmem:[#allocation3] sm:$0x1] %vm843_vm3, %v867_v27 }
 0x11f   : > { %v2625_v31 = vld [vmem:[#allocation2] sm:$0x1] }
 0x120   : > { %v2626_v37 = vmul.f32 2.0, %v2625_v31 }
 0x121   : > { %v2623_v38 = vld [vmem:[#allocation3] sm:$0x1] }
 0x122   : > { %v2624_v40 = vmul.f32 16.0, %v2623_v38  ;;  %v2628_v41 = vmul.f32 %v2627_v32, %v2626_v37 }
 0x124   : > { %v2629_v35 = vsub.f32 %v2624_v40, %v2628_v41 }
 0x126   : > { %v2632_v10 = vadd.f32 %v2631_v43, %v2629_v35  ;;  %v3073_v54 = vpop.f32.mrf.mxu0 }
 0x128   : > { %v2633_v44 = vsel %vm843_vm3, %v2632_v10, inf  ;;  %v3074_v57 = vpop.f32.mrf.mxu0 }
 0x129   : > { %2634 = vmin.xlane.f32.xlu0 %v2633_v44  ;;  %v3075_v58 = vadd.f32 %v3074_v57, %v3073_v54 }
 0x12a   : > { %v3076_v59 = vpop.f32.mrf.mxu0 }
 0x12b   : > { %v2294_v62 = vadd.f32 %v3075_v58, %v2254_v56 }
 0x12c   : > { %v3077_v63 = vpop.f32.mrf.mxu0 }
 0x130   : > { %v3095_v30 = vpop.f32.mrf.mxu1 }
 0x132   : > { %v3096_v60 = vpop.f32.mrf.mxu1 }
 0x133   : > { %v3097_v61 = vadd.f32 %v3096_v60, %v3095_v30 }
 0x134   : > { %v3098_v0 = vpop.f32.mrf.mxu1 }
 0x135   : > { %v2334_v3 = vadd.f32 %v3097_v61, %v2294_v62 }
 0x136   : > { %v3099_v1 = vpop.f32.mrf.mxu1 }
 0x146   : > { %v3117_v2 = vpop.f32.mrf.mxu0 }
 0x148   : > { %v3118_v4 = vpop.f32.mrf.mxu0 }
 0x149   : > { %v3119_v6 = vadd.f32 %v3118_v4, %v3117_v2 }
 0x14a   : > { %v3120_v7 = vpop.f32.mrf.mxu0 }
 0x14b   : > { %v2374_v9 = vadd.f32 %v3119_v6, %v2334_v3 }
 0x14c   : > { %v3121_v12 = vpop.f32.mrf.mxu0 }
 0x150   : > { %v3139_v5 = vpop.f32.mrf.mxu1 }
 0x152   : > { %v3140_v8 = vpop.f32.mrf.mxu1 }
 0x153   : > { %v3141_v11 = vadd.f32 %v3140_v8, %v3139_v5 }
 0x154   : > { %v3142_v13 = vpop.f32.mrf.mxu1 }
 0x155   : > { %v2414_v16 = vadd.f32 %v3141_v11, %v2374_v9 }
 0x156   : > { %v3143_v14 = vpop.f32.mrf.mxu1 }
 0x166   : > { %v3161_v15 = vpop.f32.mrf.mxu0 }
 0x168   : > { %v3162_v17 = vpop.f32.mrf.mxu0 }
 0x169   : > { %v3163_v19 = vadd.f32 %v3162_v17, %v3161_v15 }
 0x16a   : > { %v3164_v20 = vpop.f32.mrf.mxu0 }
 0x16b   : > { %v2454_v22 = vadd.f32 %v3163_v19, %v2414_v16 }
 0x16c   : > { %v3165_v24 = vpop.f32.mrf.mxu0 }
 0x170   : > { %v3183_v18 = vpop.f32.mrf.mxu1 }
 0x172   : > { %v3184_v21 = vpop.f32.mrf.mxu1 }
 0x173   : > { %v3185_v23 = vadd.f32 %v3184_v21, %v3183_v18 }
 0x174   : > { %v3186_v25 = vpop.f32.mrf.mxu1 }
 0x175   : > { %v2494_v28 = vadd.f32 %v3185_v23, %v2454_v22 }
 0x176   : > { %v3187_v26 = vpop.f32.mrf.mxu1 }
 0x186   : > { %v3205_v27 = vpop.f32.mrf.mxu0 }
 0x188   : > { %v3206_v29 = vpop.f32.mrf.mxu0 }
 0x189   : > { %v3207_v31 = vadd.f32 %v3206_v29, %v3205_v27 }
 0x18a   : > { %v3208_v33 = vpop.f32.mrf.mxu0 }
 0x18b   : > { %v2534_v36 = vadd.f32 %v3207_v31, %v2494_v28 }
 0x18c   : > { %v3209_v40 = vpop.f32.mrf.mxu0 }
 0x1b2   : > { %v2635_v42 = vpop.xlane.xlu0 %2634 }
 0x1b3   : > { %vm2638_vm6 = vcmp.eq.f32.partialorder %v2632_v10, %v2635_v42 }
 0x1b4   : > { %v2639_v50 = vsel %vm2638_vm6, %v2637_v39, 32 }
 0x1b5   : > { %v4247_v51 = vsel %vm843_vm3, %v2639_v50, 2147483647 }
 0x1b6   : > { %v2642_v52 = vshra.s32 %v4247_v51, 16  ;;  %v3227_v32 = vpop.f32.mrf.mxu1  ;;  %v2641_v48 = vand.u32 65535, %v4247_v51 }
 0x1b8   : > { %v4250_v53 = vcvt.s32.f32 %v2642_v52  ;;  %v3228_v37 = vpop.f32.mrf.mxu1  ;;  %v2643_v39 = vcvt.s32.f32 %v2641_v48 }
 0x1b9   : > { %v3229_v38 = vadd.f32 %v3228_v37, %v3227_v32 }
 0x1ba   : > { %2645 = vmin.xlane.f32.xlu0 %v4250_v53  ;;  %v3230_v41 = vpop.f32.mrf.mxu1 }
 0x1bb   : > { %v2574_v43 = vadd.f32 %v3229_v38, %v2534_v36 }
 0x1bc   : > { %v3231_v10 = vpop.f32.mrf.mxu1 }
 0x1be   : > { %v2613_v35 = vpop.f32.mrf.mxu0 }
 0x1bf   : > { %v2614_v44 = vadd.f32 %v2613_v35, %v2574_v43 }
 0x1c0   : > { %v3270_v45 = vpop.f32.mrf.mxu0 }
 0x1c1   : > { %2619 = vst [vmem:[%s373_s12] sm:$0x1] %v2614_v44 }
 0x1c2   : > { %v2616_v46 = vpop.f32.mrf.mxu0 }
 0x1c4   : > { %v3271_v47 = vpop.f32.mrf.mxu0 }
 0x243   : > { %v2646_v49 = vpop.xlane.xlu0 %2645 }
 0x244   : > { %vm2647_vm7 = vcmp.eq.f32.partialorder %v4250_v53, %v2646_v49  ;;  %v2652_v50 = vcvt.f32.s32 %v2646_v49 }
 0x245   : > { %v2648_v42 = vsel %vm2647_vm7, %v2643_v39, inf }
 0x246   : > { %2649 = vmin.xlane.f32.xlu1 %v2648_v42  ;;  %v2653_v54 = vshll.u32 %v2652_v50, 16 }
 0x2cf   : > { %v2650_v52 = vpop.xlane.xlu1 %2649 }
 0x2d0   : > { %v2651_v56 = vcvt.f32.s32 %v2650_v52 }
 0x2d2   : > { %v2654_v57 = vadd.s32 %v2653_v54, %v2651_v56 }
 0x2d4   : > { %v2658_v30 = vrot.slane %v2654_v57, %v2657_v55 }
 0x2d6   : > { %2659 = vst [vmem:[%s377_s15] sm:$0xff] %v2658_v30 }
 0x2d7 PF: > { %s19_s29 = sadd.s32 1, %s3514_s29   ;;  %s4285_s27 = smov %s3510_s28 }
 0x2d8   : > { %p16_p5 = scmp.ge.s32.totalorder %s19_s29, 4   ;;  %s4286_s28 = smov %s4288_s30 }
 0x2da   :  { %18 = sbr.rel (!%p16_p5) target bundleno = 2 (0x2), region = 101 }

</bundles_post_ra>
